<compile_context>
chip_gen: v5e
topology: v5e:2x2
jax: 0.10.0
libtpu: 0.0.40
codegen_flags: <defaults>
</compile_context>

<pallas_src>
import functools

import numpy as np
import jax
import jax.numpy as jnp
from jax.experimental import pallas as pl
from jax.experimental.pallas import tpu as pltpu


_VMEM_LIMIT = 32 * 1024 * 1024  # safe on v5e / v6e / v7x scoped VMEM


# --------------------------------------------------------------------------- #
# kernel A: per-point linear pillar id (feature-major, lane-dense)            #
# --------------------------------------------------------------------------- #
def _pid_kernel(pts_ref, pid_ref, *, vx, vy, px, py, gx, gy):
    # pts_ref: (D, TN) f32, rows = [batch_id, x, y, z, feats...]
    b = pts_ref[0:1, :]
    x = pts_ref[1:2, :]
    y = pts_ref[2:3, :]
    cx = (x - px) / vx
    cy = (y - py) / vy
    mask = (cx >= 0.0) & (cx < float(gx)) & (cy >= 0.0) & (cy < float(gy))
    ix = cx.astype(jnp.int32)            # trunc == floor for in-range points
    iy = cy.astype(jnp.int32)
    bi = b.astype(jnp.int32)
    pid = (bi * gx + ix) * gy + iy
    pid_ref[...] = jnp.where(mask, pid, -1)


# --------------------------------------------------------------------------- #
# kernel C: per-point features (feature-major, lane-dense, pure element-wise) #
# --------------------------------------------------------------------------- #
def _feat_kernel(pts_ref, pmean_ref, feat_ref, *, vx, vy, px, py):
    # pts_ref : (D, TN) f32, pmean_ref: (3, TN) f32, feat_ref: (D+4, TN) f32
    d = pts_ref.shape[0]
    x = pts_ref[1:2, :]
    y = pts_ref[2:3, :]
    cx = (x - px) / vx
    cy = (y - py) / vy
    ixf = cx.astype(jnp.int32).astype(jnp.float32)
    iyf = cy.astype(jnp.int32).astype(jnp.float32)

    # raw point features (x, y, z, r, ...)
    feat_ref[0:d - 1, :] = pts_ref[1:d, :]
    # f_cluster = xyz - per-pillar mean
    feat_ref[d - 1:d + 2, :] = pts_ref[1:4, :] - pmean_ref[...]
    # f_center = xy - pillar center
    feat_ref[d + 2:d + 3, :] = x - (ixf * vx + (0.5 * vx + px))
    feat_ref[d + 3:d + 4, :] = y - (iyf * vy + (0.5 * vy + py))


# --------------------------------------------------------------------------- #
# jitted static-shape pipeline: pad -> kernel A -> segment mean -> kernel C   #
# --------------------------------------------------------------------------- #
@functools.partial(
    jax.jit,
    static_argnames=("batch_size", "gx", "gy", "vx", "vy", "px", "py",
                     "tile_n"))
def _pillar_forward_static(points, *, batch_size, gx, gy, vx, vy, px, py,
                           tile_n):
    n, d = points.shape
    f_out = (d - 1) + 3 + 2
    n_pillars = int(batch_size) * gx * gy

    n_pad = ((n + tile_n - 1) // tile_n) * tile_n
    num_tiles = n_pad // tile_n

    points = points.astype(jnp.float32)
    if n_pad != n:
        # sentinel points guaranteed outside the xy grid -> pid = -1
        pad = jnp.zeros((n_pad - n, d), jnp.float32)
        pad = pad.at[:, 1].set(px - 10.0 * vx)
        pad = pad.at[:, 2].set(py - 10.0 * vy)
        points_pad = jnp.concatenate([points, pad], axis=0)
    else:
        points_pad = points

    points_fm = points_pad.T                                   # (D, N_pad)

    # ---- kernel A: pillar id per point -------------------------------------
    pid_fm = pl.pallas_call(
        functools.partial(_pid_kernel, vx=vx, vy=vy, px=px, py=py,
                          gx=gx, gy=gy),
        grid=(num_tiles,),
        in_specs=[pl.BlockSpec((d, tile_n), lambda t: (0, t))],
        out_specs=pl.BlockSpec((1, tile_n), lambda t: (0, t)),
        out_shape=jax.ShapeDtypeStruct((1, n_pad), jnp.int32),
        compiler_params=pltpu.CompilerParams(
            dimension_semantics=("parallel",),
            vmem_limit_bytes=_VMEM_LIMIT),
    )(points_fm)
    pid = pid_fm[0]                                            # (N_pad,)
    valid = pid >= 0

    # ---- per-pillar mean: vectorized segmented reduction in plain XLA ------
    # (invalid / padding points go to an extra dump bucket with zero weight)
    seg = jnp.where(valid, pid, n_pillars).astype(jnp.int32)
    w = valid.astype(jnp.float32)
    sums = jax.ops.segment_sum(points_pad[:, 1:4] * w[:, None], seg,
                               num_segments=n_pillars + 1)
    counts = jax.ops.segment_sum(w, seg, num_segments=n_pillars + 1)
    mean3 = sums[:n_pillars] / jnp.maximum(counts[:n_pillars, None], 1.0)

    # per-point gather of the pillar mean (memory-bound XLA gather, fused
    # inside the same jit)
    pt_mean_fm = jnp.take(mean3, jnp.maximum(pid, 0), axis=0).T  # (3, N_pad)

    # ---- kernel C: per-point feature construction --------------------------
    feats_fm = pl.pallas_call(
        functools.partial(_feat_kernel, vx=vx, vy=vy, px=px, py=py),
        grid=(num_tiles,),
        in_specs=[pl.BlockSpec((d, tile_n), lambda t: (0, t)),
                  pl.BlockSpec((3, tile_n), lambda t: (0, t))],
        out_specs=pl.BlockSpec((f_out, tile_n), lambda t: (0, t)),
        out_shape=jax.ShapeDtypeStruct((f_out, n_pad), jnp.float32),
        compiler_params=pltpu.CompilerParams(
            dimension_semantics=("parallel",),
            vmem_limit_bytes=_VMEM_LIMIT),
    )(points_fm, pt_mean_fm)

    feats = feats_fm.T[:n]                                     # (N, f_out)
    return feats, pid[:n], valid[:n]


class PillarNet:
    """JAX/Pallas re-implementation of the PyTorch PillarNet reader."""

    def __init__(self, num_input_features, voxel_size, pc_range):
        self.num_input_features = num_input_features
        self.voxel_size = np.array(voxel_size, dtype=np.float64)
        self.pc_range = np.array(pc_range, dtype=np.float64)
        gs = (self.pc_range[3:] - self.pc_range[:3]) / self.voxel_size
        self.grid_size = np.round(gs).astype(np.int64)          # [GX, GY, GZ]

    def __call__(self, points, batch_size, tile_n=4096):
        gx, gy = int(self.grid_size[0]), int(self.grid_size[1])
        vx, vy = float(self.voxel_size[0]), float(self.voxel_size[1])
        px, py = float(self.pc_range[0]), float(self.pc_range[1])
        tile_n = max(128, (int(tile_n) // 128) * 128)            # lane-dense

        feats, pid_n, valid = _pillar_forward_static(
            jnp.asarray(points, jnp.float32),
            batch_size=int(batch_size), gx=gx, gy=gy,
            vx=vx, vy=vy, px=px, py=py, tile_n=tile_n)

        # ---- data-dependent-shape bookkeeping stays outside jit ------------
        # TODO(synk): jnp.unique / boolean filtering are data-dependent; run
        # eagerly here (or pass a static size= if this must live under jit).
        unq_pid = jnp.unique(pid_n[valid])                       # valid pillars
        unq_inv = jnp.searchsorted(unq_pid, pid_n)
        unq_inv = jnp.where(valid, unq_inv, -1).astype(jnp.int32)
        b = unq_pid // (gx * gy)
        rem = unq_pid % (gx * gy)
        ux = rem // gy
        uy = rem % gy
        unq = jnp.stack([b, uy, ux], axis=1).astype(jnp.int32)   # [batch,iy,ix]
        grid_size_yx = jnp.array([gy, gx], dtype=jnp.int32)
        return feats, unq, unq_inv, grid_size_yx, valid


# --------------------------------------------------------------------------- #
# float64 numpy reference (mirrors the PyTorch forward)                       #
# --------------------------------------------------------------------------- #
def _numpy_reference(points, voxel_size, pc_range):
    pts = np.asarray(points, dtype=np.float64)
    vsz = np.asarray(voxel_size, dtype=np.float64)
    pcr = np.asarray(pc_range, dtype=np.float64)
    gs = np.round((pcr[3:] - pcr[:3]) / vsz).astype(np.int64)
    coords = (pts[:, 1:4] - pcr[:3]) / vsz
    mask = ((coords[:, 0] >= 0) & (coords[:, 0] < gs[0]) &
            (coords[:, 1] >= 0) & (coords[:, 1] < gs[1]))
    ix = coords[:, 0].astype(np.int64)
    iy = coords[:, 1].astype(np.int64)
    b = pts[:, 0].astype(np.int64)
    pid = (b * gs[0] + ix) * gs[1] + iy
    means = np.zeros((pts.shape[0], 3))
    for u in np.unique(pid[mask]):
        sel = mask & (pid == u)
        means[sel] = pts[sel, 1:4].mean(axis=0)
    f_cluster = pts[:, 1:4] - means
    f_center = pts[:, 1:3] - (np.stack([ix, iy], 1) * vsz[:2] + vsz[:2] / 2 + pcr[:2])
    feats = np.concatenate([pts[:, 1:], f_cluster, f_center], axis=-1)
    return feats.astype(np.float32), pid, mask, b, ix, iy


if __name__ == "__main__":
    # deterministic small setup: batch=2, 16x16 xy grid, 4 point feats,
    # 200 in-range + 8 out-of-range points.
    num_input_features = 4                         # x, y, z, r
    voxel_size = [0.5, 0.5, 8.0]
    pc_range = [0.0, 0.0, -4.0, 8.0, 8.0, 4.0]     # -> grid (16, 16, 1)
    batch_size = 2
    n_in, n_out = 200, 8
    N = n_in + n_out

    key = jax.random.PRNGKey(0)
    k1, k2, k3, k4, k5 = jax.random.split(key, 5)
    bid = jax.random.randint(k1, (N, 1), 0, batch_size).astype(jnp.float32)
    xy_in = jax.random.uniform(k2, (n_in, 2), minval=0.25, maxval=7.75,
                               dtype=jnp.float32)
    xy_bad = jnp.stack(
        [jnp.where(jnp.arange(n_out) % 2 == 0, -3.0, 12.0).astype(jnp.float32),
         jax.random.uniform(k5, (n_out,), minval=0.25, maxval=7.75,
                            dtype=jnp.float32)], axis=1)
    xy = jnp.concatenate([xy_in, xy_bad], axis=0)
    z = jax.random.uniform(k3, (N, 1), minval=-3.0, maxval=3.0, dtype=jnp.float32)
    r = jax.random.uniform(k4, (N, 1), minval=0.0, maxval=1.0, dtype=jnp.float32)
    points = jnp.concatenate([bid, xy, z, r], axis=1)           # (N, 5)

    net = PillarNet(num_input_features, voxel_size, pc_range)
    feats_ref, pid_ref_np, mask_ref, b_ref, ix_ref, iy_ref = _numpy_reference(
        points, voxel_size, pc_range)

    # exercise both a multi-tile grid (tile_n=128 -> 2 tiles) and the large
    # default production tile (tile_n=4096 -> 1 tile here)
    for tn in (128, 4096):
        feats, unq, unq_inv, grid_size_yx, valid = net(points, batch_size,
                                                       tile_n=tn)
        jax.block_until_ready((feats, unq, unq_inv, grid_size_yx, valid))

        valid_np = np.asarray(valid)
        np.testing.assert_array_equal(valid_np, mask_ref)
        np.testing.assert_allclose(np.asarray(feats)[valid_np],
                                   feats_ref[valid_np], rtol=1e-4, atol=1e-4)
        # unq[unq_inv] must recover each valid point's (batch, iy, ix)
        recon = np.asarray(unq)[np.asarray(unq_inv)[valid_np]]
        np.testing.assert_array_equal(recon[:, 0], b_ref[mask_ref])
        np.testing.assert_array_equal(recon[:, 1], iy_ref[mask_ref])
        np.testing.assert_array_equal(recon[:, 2], ix_ref[mask_ref])
        assert np.asarray(unq).shape[0] == len(np.unique(pid_ref_np[mask_ref]))
        assert list(np.asarray(grid_size_yx)) == [16, 16]

    print("KERNEL_OK")
</pallas_src>

<mosaic_0001>
module attributes {stable_mosaic.version = 11 : i64} {
  func.func @_pid_kernel(%arg0: i32, %arg1: memref<5x128xf32, #tpu.memory_space<vmem>>, %arg2: memref<1x128xi32, #tpu.memory_space<vmem>>) attributes {dimension_semantics = [#tpu.dimension_semantics<parallel>], iteration_bounds = array<i64: 2>, scalar_prefetch = 0 : i64, scratch_operands = 0 : i64, tpu.core_type = #tpu.core_type<tc>, window_params = [{transform_indices = @transform_0, window_bounds = array<i64: 5, 128>}, {transform_indices = @transform_1, window_bounds = array<i64: 1, 128>}]} {
    %c0 = arith.constant 0 : index
    %c0_0 = arith.constant 0 : index
    %0 = vector.load %arg1[%c0, %c0_0] : memref<5x128xf32, #tpu.memory_space<vmem>>, vector<1x128xf32>
    %c1 = arith.constant 1 : index
    %c0_1 = arith.constant 0 : index
    %1 = vector.load %arg1[%c1, %c0_1] : memref<5x128xf32, #tpu.memory_space<vmem>>, vector<1x128xf32>
    %c2 = arith.constant 2 : index
    %c0_2 = arith.constant 0 : index
    %2 = vector.load %arg1[%c2, %c0_2] : memref<5x128xf32, #tpu.memory_space<vmem>>, vector<1x128xf32>
    %cst = arith.constant 0.000000e+00 : f32
    %3 = vector.broadcast %cst : f32 to vector<1x128xf32>
    %4 = arith.subf %1, %3 : vector<1x128xf32>
    %cst_3 = arith.constant 5.000000e-01 : f32
    %5 = vector.broadcast %cst_3 : f32 to vector<1x128xf32>
    %6 = arith.divf %4, %5 : vector<1x128xf32>
    %cst_4 = arith.constant 0.000000e+00 : f32
    %7 = vector.broadcast %cst_4 : f32 to vector<1x128xf32>
    %8 = arith.subf %2, %7 : vector<1x128xf32>
    %cst_5 = arith.constant 5.000000e-01 : f32
    %9 = vector.broadcast %cst_5 : f32 to vector<1x128xf32>
    %10 = arith.divf %8, %9 : vector<1x128xf32>
    %cst_6 = arith.constant 0.000000e+00 : f32
    %11 = vector.broadcast %cst_6 : f32 to vector<1x128xf32>
    %12 = arith.cmpf oge, %6, %11 : vector<1x128xf32>
    %cst_7 = arith.constant 1.600000e+01 : f32
    %13 = vector.broadcast %cst_7 : f32 to vector<1x128xf32>
    %14 = arith.cmpf olt, %6, %13 : vector<1x128xf32>
    %15 = arith.andi %12, %14 : vector<1x128xi1>
    %cst_8 = arith.constant 0.000000e+00 : f32
    %16 = vector.broadcast %cst_8 : f32 to vector<1x128xf32>
    %17 = arith.cmpf oge, %10, %16 : vector<1x128xf32>
    %18 = arith.andi %15, %17 : vector<1x128xi1>
    %cst_9 = arith.constant 1.600000e+01 : f32
    %19 = vector.broadcast %cst_9 : f32 to vector<1x128xf32>
    %20 = arith.cmpf olt, %10, %19 : vector<1x128xf32>
    %21 = arith.andi %18, %20 : vector<1x128xi1>
    %22 = arith.fptosi %6 : vector<1x128xf32> to vector<1x128xi32>
    %23 = arith.fptosi %10 : vector<1x128xf32> to vector<1x128xi32>
    %24 = arith.fptosi %0 : vector<1x128xf32> to vector<1x128xi32>
    %c16_i32 = arith.constant 16 : i32
    %25 = vector.broadcast %c16_i32 : i32 to vector<1x128xi32>
    %26 = arith.muli %24, %25 : vector<1x128xi32>
    %27 = arith.addi %26, %22 : vector<1x128xi32>
    %c16_i32_10 = arith.constant 16 : i32
    %28 = vector.broadcast %c16_i32_10 : i32 to vector<1x128xi32>
    %29 = arith.muli %27, %28 : vector<1x128xi32>
    %30 = arith.addi %29, %23 : vector<1x128xi32>
    %c-1_i32 = arith.constant -1 : i32
    %31 = vector.broadcast %c-1_i32 : i32 to vector<1x128xi32>
    %32 = arith.select %21, %30, %31 : vector<1x128xi1>, vector<1x128xi32>
    %c0_11 = arith.constant 0 : index
    %c0_12 = arith.constant 0 : index
    %33 = vector.load %arg2[%c0_11, %c0_12] : memref<1x128xi32, #tpu.memory_space<vmem>>, vector<1x128xi32>
    tpu.vector_store %arg2[%c0_11, %c0_12], %32 {strides = array<i32>} : memref<1x128xi32, #tpu.memory_space<vmem>>, vector<1x128xi32>,
    return
  }
  func.func @transform_0(%arg0: i32) -> (i32, i32) {
    %c0_i32 = arith.constant 0 : i32
    %c0_i32_0 = arith.constant 0 : i32
    return %c0_i32, %arg0 : i32, i32
  }
  func.func @transform_1(%arg0: i32) -> (i32, i32) {
    %c0_i32 = arith.constant 0 : i32
    %c0_i32_0 = arith.constant 0 : i32
    return %c0_i32, %arg0 : i32, i32
  }
}

module attributes {stable_mosaic.version = 11 : i64} {
  func.func @_feat_kernel(%arg0: i32, %arg1: memref<5x128xf32, #tpu.memory_space<vmem>>, %arg2: memref<3x128xf32, #tpu.memory_space<vmem>>, %arg3: memref<9x128xf32, #tpu.memory_space<vmem>>) attributes {dimension_semantics = [#tpu.dimension_semantics<parallel>], iteration_bounds = array<i64: 2>, scalar_prefetch = 0 : i64, scratch_operands = 0 : i64, tpu.core_type = #tpu.core_type<tc>, window_params = [{transform_indices = @transform_0, window_bounds = array<i64: 5, 128>}, {transform_indices = @transform_1, window_bounds = array<i64: 3, 128>}, {transform_indices = @transform_2, window_bounds = array<i64: 9, 128>}]} {
    %c1 = arith.constant 1 : index
    %c0 = arith.constant 0 : index
    %0 = vector.load %arg1[%c1, %c0] : memref<5x128xf32, #tpu.memory_space<vmem>>, vector<1x128xf32>
    %c2 = arith.constant 2 : index
    %c0_0 = arith.constant 0 : index
    %1 = vector.load %arg1[%c2, %c0_0] : memref<5x128xf32, #tpu.memory_space<vmem>>, vector<1x128xf32>
    %cst = arith.constant 0.000000e+00 : f32
    %2 = vector.broadcast %cst : f32 to vector<1x128xf32>
    %3 = arith.subf %0, %2 : vector<1x128xf32>
    %cst_1 = arith.constant 5.000000e-01 : f32
    %4 = vector.broadcast %cst_1 : f32 to vector<1x128xf32>
    %5 = arith.divf %3, %4 : vector<1x128xf32>
    %cst_2 = arith.constant 0.000000e+00 : f32
    %6 = vector.broadcast %cst_2 : f32 to vector<1x128xf32>
    %7 = arith.subf %1, %6 : vector<1x128xf32>
    %cst_3 = arith.constant 5.000000e-01 : f32
    %8 = vector.broadcast %cst_3 : f32 to vector<1x128xf32>
    %9 = arith.divf %7, %8 : vector<1x128xf32>
    %10 = arith.fptosi %5 : vector<1x128xf32> to vector<1x128xi32>
    %11 = arith.sitofp %10 : vector<1x128xi32> to vector<1x128xf32>
    %12 = arith.fptosi %9 : vector<1x128xf32> to vector<1x128xi32>
    %13 = arith.sitofp %12 : vector<1x128xi32> to vector<1x128xf32>
    %c1_4 = arith.constant 1 : index
    %c0_5 = arith.constant 0 : index
    %14 = vector.load %arg1[%c1_4, %c0_5] : memref<5x128xf32, #tpu.memory_space<vmem>>, vector<4x128xf32>
    %c0_6 = arith.constant 0 : index
    %c0_7 = arith.constant 0 : index
    %15 = vector.load %arg3[%c0_6, %c0_7] : memref<9x128xf32, #tpu.memory_space<vmem>>, vector<4x128xf32>
    tpu.vector_store %arg3[%c0_6, %c0_7], %14 {strides = array<i32>} : memref<9x128xf32, #tpu.memory_space<vmem>>, vector<4x128xf32>,
    %c1_8 = arith.constant 1 : index
    %c0_9 = arith.constant 0 : index
    %16 = vector.load %arg1[%c1_8, %c0_9] : memref<5x128xf32, #tpu.memory_space<vmem>>, vector<3x128xf32>
    %c0_10 = arith.constant 0 : index
    %c0_11 = arith.constant 0 : index
    %17 = vector.load %arg2[%c0_10, %c0_11] : memref<3x128xf32, #tpu.memory_space<vmem>>, vector<3x128xf32>
    %18 = arith.subf %16, %17 : vector<3x128xf32>
    %c4 = arith.constant 4 : index
    %c0_12 = arith.constant 0 : index
    %19 = vector.load %arg3[%c4, %c0_12] : memref<9x128xf32, #tpu.memory_space<vmem>>, vector<3x128xf32>
    tpu.vector_store %arg3[%c4, %c0_12], %18 {strides = array<i32>} : memref<9x128xf32, #tpu.memory_space<vmem>>, vector<3x128xf32>,
    %cst_13 = arith.constant 5.000000e-01 : f32
    %20 = vector.broadcast %cst_13 : f32 to vector<1x128xf32>
    %21 = arith.mulf %11, %20 : vector<1x128xf32>
    %cst_14 = arith.constant 2.500000e-01 : f32
    %22 = vector.broadcast %cst_14 : f32 to vector<1x128xf32>
    %23 = arith.addf %21, %22 : vector<1x128xf32>
    %24 = arith.subf %0, %23 : vector<1x128xf32>
    %c7 = arith.constant 7 : index
    %c0_15 = arith.constant 0 : index
    %25 = vector.load %arg3[%c7, %c0_15] : memref<9x128xf32, #tpu.memory_space<vmem>>, vector<1x128xf32>
    tpu.vector_store %arg3[%c7, %c0_15], %24 {strides = array<i32>} : memref<9x128xf32, #tpu.memory_space<vmem>>, vector<1x128xf32>,
    %cst_16 = arith.constant 5.000000e-01 : f32
    %26 = vector.broadcast %cst_16 : f32 to vector<1x128xf32>
    %27 = arith.mulf %13, %26 : vector<1x128xf32>
    %cst_17 = arith.constant 2.500000e-01 : f32
    %28 = vector.broadcast %cst_17 : f32 to vector<1x128xf32>
    %29 = arith.addf %27, %28 : vector<1x128xf32>
    %30 = arith.subf %1, %29 : vector<1x128xf32>
    %c8 = arith.constant 8 : index
    %c0_18 = arith.constant 0 : index
    %31 = vector.load %arg3[%c8, %c0_18] : memref<9x128xf32, #tpu.memory_space<vmem>>, vector<1x128xf32>
    tpu.vector_store %arg3[%c8, %c0_18], %30 {strides = array<i32>} : memref<9x128xf32, #tpu.memory_space<vmem>>, vector<1x128xf32>,
    return
  }
  func.func @transform_0(%arg0: i32) -> (i32, i32) {
    %c0_i32 = arith.constant 0 : i32
    %c0_i32_0 = arith.constant 0 : i32
    return %c0_i32, %arg0 : i32, i32
  }
  func.func @transform_1(%arg0: i32) -> (i32, i32) {
    %c0_i32 = arith.constant 0 : i32
    %c0_i32_0 = arith.constant 0 : i32
    return %c0_i32, %arg0 : i32, i32
  }
  func.func @transform_2(%arg0: i32) -> (i32, i32) {
    %c0_i32 = arith.constant 0 : i32
    %c0_i32_0 = arith.constant 0 : i32
    return %c0_i32, %arg0 : i32, i32
  }
}

</mosaic_0001>

<bundles_post_ra>
// kernel: _pillar_forward_static.2
= control target key start
LH: loop header
LB: loop body
LE: loop exit
PB: predicated region body
PF: predicated region fallthrough
CT: control target
= control target key end

     0   :  { %s238_s6 = smov 0   ;;  %s259_s0 = inlined_call_operand.vmem [shape: f32[5,256], index: 0, kind: input, shape index: {}]   ;;  %s260_s1 = inlined_call_operand.vmem [shape: s32[1,256], index: 1, kind: output, shape index: {}]  }
   0x1 LB: > { %s185_s7 = sadd.s32 4294967295, %s225_s6   ;;  %p189_p0 = scmp.ge.s32.totalorder %s225_s6, 1  ;;  %s225_s6 = sphi %s238_s6, %s11_s6  }
   0x2   : > { %p86_p1 = scmp.lt.s32.totalorder %s225_s6, 3 }
   0x4   : > { %p87_p2 = pnand %p189_p0, %p86_p1 }
   0x5   : > { %p103_p3 = scmp.lt.s32.totalorder (!%p87_p2), %s185_s7, 1 }
   0x6   : > { %90 = sbr.rel (%p87_p2) target bundleno = 44 (0x2c), region = 24 }
   0xb   : > { %v227_v0 = vmov 0.5   ;;  %s262_s7 = smov (!%p103_p3, %s185_s7), 1 }
   0xc   : > { %217 = vrcp.f32 %v227_v0  ;;  %s190_s8 = sshll.u32 %s262_s7, 3  ;;  %s109_s14 = scalar_lea.vmem %s260_s1, %s262_s7 }
   0xd   : > { %s106_s11 = scalar_lea.vmem %s259_s0, %s190_s8 }
   0xe   : > { %v110_v2 = vld [vmem:[%s106_s11] sm:$0x1]  ;;  %v111_v8 = vld [vmem:[%s106_s11 + $0x1] sm:$0x1]  ;;  %v112_v9 = vld [vmem:[%s106_s11 + $0x2] sm:$0x1] }
   0xf   : > { %v204_v5 = vceil.f32 %v110_v2  ;;  %v205_v6 = vfloor.f32 %v110_v2  ;;  %vm203_vm0 = vcmp.lt.s32.totalorder %v110_v2, 0 }
  0x11   : > { %v206_v11 = vsel %vm203_vm0, %v204_v5, %v205_v6 }
  0x12   : > { %v218_v1 = vpop.eup %217  ;;  %v207_v15 = vcvt.f32.s32 %v206_v11 }
  0x13   : > { %v114_v3 = vmul.f32 0.5, %v218_v1  ;;  %vm118_vm1 = vweird.f32 %v218_v1 }
  0x14   : > { %v132_v20 = vmul.u32 16, %v207_v15 }
  0x15   : > { %v115_v4 = vsub.f32 1.0, %v114_v3 }
  0x17   : > { %v116_v7 = vmul.f32 %v218_v1, %v115_v4 }
  0x19   : > { %v117_v10 = vadd.f32 %v218_v1, %v116_v7 }
  0x1b   : > { %v119_v12 = vsel %vm118_vm1, %v218_v1, %v117_v10 }
  0x1c   : > { %v120_v13 = vmul.f32 %v119_v12, %v111_v8  ;;  %v121_v14 = vmul.f32 %v119_v12, %v112_v9 }
  0x1e   : > { %vm122_vm2 = vcmp.ge.f32.partialorder %v120_v13, 0.0  ;;  %vm123_vm3 = vcmp.lt.f32.partialorder %v120_v13, 16.0  ;;  %vm193_vm4 = vcmp.lt.s32.totalorder %v120_v13, 0  ;;  %v194_v16 = vceil.f32 %v120_v13 }
  0x1f   : > { %v195_v17 = vfloor.f32 %v120_v13  ;;  %vm198_vm5 = vcmp.lt.s32.totalorder %v121_v14, 0  ;;  %v199_v18 = vceil.f32 %v121_v14  ;;  %v200_v19 = vfloor.f32 %v121_v14  ;;  %vm124_vm6 = vmand %vm122_vm2, %vm123_vm3 }
  0x20   : > { %vm125_vm7 = vcmp.ge.f32.partialorder %v121_v14, 0.0  ;;  %vm127_vm9 = vcmp.lt.f32.partialorder %v121_v14, 16.0 }
  0x21   : > { %v196_v21 = vsel %vm193_vm4, %v194_v16, %v195_v17  ;;  %v201_v23 = vsel %vm198_vm5, %v199_v18, %v200_v19  ;;  %vm126_vm8 = vmand %vm124_vm6, %vm125_vm7 }
  0x22   : > { %v197_v22 = vcvt.f32.s32 %v196_v21  ;;  %v202_v24 = vcvt.f32.s32 %v201_v23  ;;  %vm128_vm10 = vmand %vm126_vm8, %vm127_vm9 }
  0x24   : > { %v133_v25 = vadd.s32 %v197_v22, %v132_v20 }
  0x26   : > { %v134_v26 = vmul.u32 16, %v133_v25 }
  0x28   : > { %v135_v27 = vadd.s32 %v202_v24, %v134_v26 }
  0x2a   : > { %v136_v28 = vsel %vm128_vm10, %v135_v27, 4294967295 }
  0x2b   : > { %137 = vst [vmem:[%s109_s14] sm:$0x1] %v136_v28 }
  0x2c PF: > { %s11_s6 = sadd.s32 1, %s225_s6  }
  0x2d   : > { %p8_p4 = scmp.ge.s32.totalorder %s11_s6, 4  }
  0x2f   :  { %10 = sbr.rel (!%p8_p4) target bundleno = 1 (0x1), region = 54 }

// kernel: _pillar_forward_static.3
= control target key start
LH: loop header
LB: loop body
LE: loop exit
PB: predicated region body
PF: predicated region fallthrough
CT: control target
= control target key end

     0   :  { %7 = vsyncpa [#allocation3], 0  ;;  %s522_s0 = inlined_call_operand.vmem [shape: f32[5,256], index: 0, kind: input, shape index: {}]   ;;  %s523_s1 = inlined_call_operand.vmem [shape: f32[3,256], index: 1, kind: input, shape index: {}]   ;;  %s524_s2 = inlined_call_operand.hbm [shape: f32[9,256], index: 2, kind: output, shape index: {}]  }
   0x1   :  { %9 = vsyncpa [#allocation3 + $0x1], 0  ;;  %s423_s9 = smov 0   ;;  %s425_s10 = smov 0  }
   0x2   :  { %s427_s11 = smov 0   ;;  %s429_s12 = smov 0  }
   0x3 LB: > { %s444_s13 = sadd.s32 4294967295, %s402_s12   ;;  %s274_s14 = sadd.s32 4294967294, %s402_s12   ;;  %s402_s12 = sphi %s429_s12, %s530_s12   ;;  %s398_s11 = sphi %s427_s11, %s529_s11   ;;  %s394_s10 = sphi %s425_s10, %s528_s10   ;;  %s390_s9 = sphi %s423_s9, %s527_s9  }
   0x4   : > { %s448_s15 = sadd.s32 1, %s402_s12   ;;  %s74_s16 = sadd.s32 1, %s398_s11 }
   0x5   : > { %s71_s17 = ssub.s32 %s402_s12, %s448_s15  ;;  %p84_p0 = scmp.ne.s32.totalorder %s398_s11, %s394_s10 }
   0x6   : > { %p72_p1 = scmp.eq.s32.totalorder %s71_s17, 0  ;;  %p85_p2 = scmp.eq.s32.totalorder %s444_s13, 1 }
   0x7   : > { %p90_p3 = scmp.ne.s32.totalorder %s394_s10, %s390_s9  ;;  %p91_p4 = scmp.eq.s32.totalorder %s274_s14, 1 }
   0x8   : > { %s459_s18 = scalar_select %p72_p1, %s398_s11, %s74_s16  }
   0x9   : > { %p461_p5 = por %p85_p2, %p84_p0  ;;  %p465_p6 = por %p91_p4, %p90_p3 }
   0xa   : > { %p277_p7 = scmp.ge.s32.totalorder %s402_s12, 1  ;;  %p123_p8 = scmp.lt.s32.totalorder %s402_s12, 3 }
   0xc   : > { %p124_p9 = pnand %p277_p7, %p123_p8 }
   0xd   : > { %s145_s21 = sand.u32 (!%p124_p9), 1, %s394_s10   ;;  %p148_p10 = scmp.lt.s32.totalorder (!%p124_p9), %s444_s13, 1 }
   0xe   : > { %127 = sbr.rel (%p124_p9) target bundleno = 57 (0x39), region = 28  ;;  %s278_s22 = sshll.u32 (!%p124_p9), %s145_s21, 4 }
   0xf   : > { %s482_s4 = scalar_lea.vmem (!%p124_p9), [#allocation2], %s278_s22  ;;  %s282_s5 = sshll.u32 (!%p124_p9), %s444_s13, 3 }
  0x10   : > { %s196_s8 = scalar_lea.hbm (!%p124_p9), %s524_s2, %s282_s5  ;;  %s197_s14 = sshll.u32 (!%p124_p9), %s482_s4, 4  ;;  %s198_s14 = int_to_ptr.vmem [resolvable:$true] %s197_s14 }
  0x11   : > { %s199_s16 = sshll.u32 (!%p124_p9), %s196_s8, 4  ;;  %s360_s25 = scalar_lea.hbm (!%p124_p9), %s524_s2, 32  ;;  %s200_s16 = int_to_ptr.hbm [resolvable:$true] %s199_s16 }
  0x12   : > { %s354_s17 = sshra.s32 (!%p124_p9), %s200_s16, 4  ;;  %s355_s17 = int_to_ptr.hbm [resolvable:$true] %s354_s17 }
  0x13   : > { %v404_v0 = vmov 0.5   ;;  %s149_s23 = scalar_select %p148_p10, %s444_s13, 1 }
  0x14   : > { %338 = vrcp.f32 %v404_v0  ;;  %s186_s13 = scalar_lea.sflag [#allocation3], %s145_s21  ;;  %s356_s22 = scalar_lea.hbm %s355_s17, 16 }
  0x15   : > { %s279_s24 = sshll.u32 %s149_s23, 3  ;;  %s280_s28 = sshll.u32 %s149_s23, 2 }
  0x16   : > { %s151_s27 = scalar_lea.vmem %s522_s0, %s279_s24  ;;  %s155_s3 = scalar_lea.vmem %s523_s1, %s280_s28 }
  0x17   : > { %v171_v2 = vld [vmem:[%s151_s27 + $0x1] sm:$0xf]  ;;  %p357_p11 = scmp.ne.s32.totalorder %s355_s17, %s356_s22  ;;  %p361_p0 = scmp.lt.s32.totalorder %s355_s17, %s524_s2 }
  0x18   : > { %v173_v3 = vld [vmem:[%s151_s27 + $0x1] sm:$0x7]  ;;  %172 = vst [vmem:[%s482_s4] sm:$0xf] %v171_v2  ;;  %p362_p1 = scmp.lt.s32.totalorder %s360_s25, %s356_s22 }
  0x19   : > { %v174_v4 = vld [vmem:[%s155_s3] sm:$0x7]  ;;  %p358_p12 = pnand %p357_p11, %p461_p5 }
  0x1a   : > { %v339_v1 = vpop.eup %338  ;;  %v175_v6 = vsub.f32 %v173_v3, %v174_v4  ;;  %v156_v9 = vld [vmem:[%s151_s27 + $0x1] sm:$0x1]  ;;  %v157_v11 = vld [vmem:[%s151_s27 + $0x2] sm:$0x1]  ;;  %p363_p2 = por %p362_p1, %p361_p0 }
  0x1b   : > { %v159_v5 = vmul.f32 0.5, %v339_v1  ;;  %vm163_vm0 = vweird.f32 %v339_v1  ;;  %p359_p13 = pneg %p358_p12 }
  0x1c   : > { %176 = vst [vmem:[%s482_s4 + $0x4] sm:$0x7] %v175_v6 }
  0x1d   : > { %v160_v7 = vsub.f32 1.0, %v159_v5  ;;  %p364_p3 = pnand %p363_p2, %p359_p13 }
  0x1f   : > { %v161_v8 = vmul.f32 %v339_v1, %v160_v7 }
  0x21   : > { %v162_v10 = vadd.f32 %v339_v1, %v161_v8 }
  0x23   : > { %v164_v12 = vsel %vm163_vm0, %v339_v1, %v162_v10 }
  0x24   : > { %v165_v13 = vmul.f32 %v164_v12, %v156_v9  ;;  %v166_v14 = vmul.f32 %v164_v12, %v157_v11 }
  0x26   : > { %vm285_vm1 = vcmp.lt.s32.totalorder %v165_v13, 0  ;;  %v286_v15 = vceil.f32 %v165_v13  ;;  %v287_v16 = vfloor.f32 %v165_v13  ;;  %vm290_vm2 = vcmp.lt.s32.totalorder %v166_v14, 0 }
  0x27   : > { %v291_v17 = vceil.f32 %v166_v14  ;;  %v292_v18 = vfloor.f32 %v166_v14 }
  0x28   : > { %v288_v19 = vsel %vm285_vm1, %v286_v15, %v287_v16 }
  0x29   : > { %v289_v20 = vcvt.f32.s32 %v288_v19  ;;  %v293_v21 = vsel %vm290_vm2, %v291_v17, %v292_v18 }
  0x2a   : > { %v294_v22 = vcvt.f32.s32 %v293_v21 }
  0x2b   : > { %v168_v23 = vcvt.s32.f32 %v289_v20 }
  0x2c   : > { %v170_v24 = vcvt.s32.f32 %v294_v22 }
  0x2d   : > { %v177_v25 = vmul.f32 0.5, %v168_v23 }
  0x2e   : > { %v181_v26 = vmul.f32 0.5, %v170_v24 }
  0x2f   : > { %v178_v27 = vadd.f32 0.25, %v177_v25 }
  0x30   : > { %v182_v28 = vadd.f32 0.25, %v181_v26 }
  0x31   : > { %v179_v29 = vsub.f32 %v156_v9, %v178_v27 }
  0x32   : > { %v183_v30 = vsub.f32 %v157_v11, %v182_v28 }
  0x33   : > { %180 = vst [vmem:[%s482_s4 + $0x7] sm:$0x1] %v179_v29 }
  0x34   : > { %184 = vst [vmem:[%s482_s4 + $0x8] sm:$0x1] %v183_v30 }
  0x35   : > { %367 = shalt.err (!%p364_p3)
}
  0x36   : > { %s405_s21 = smov 128   ;;  %s406_s28 = smov 256  }
  0x37   : > { %s407_s29 = smov 8  }
  0x38   : > { %295 = dma.vmem_to_hbm [thread:$0]  (%p461_p5), %s198_s14, 256, %s200_s16, %s186_s13, %s405_s21, %s406_s28, %s407_s29  }
  0x39 PF: > { %p301_p4 = scmp.ge.s32.totalorder %s402_s12, 2  ;;  %s214_s30 = sand.u32 1, %s390_s9  }
  0x3a   : > { %s215_s3 = scalar_lea.sflag [#allocation3], %s214_s30 }
  0x3b   : > { %p298_p7 = pnand %p301_p4, %p465_p6 }
  0x3d   : > { %p299_p8 = pneg %p298_p7 }
  0x3f   : > { %385 = dma.done.wait (%p299_p8), %s215_s3, 256  }
  0x40   : > { %387 = vsyncadd (%p299_p8), %s215_s3, 4294967040  ;;  %p12_p9 = scmp.ge.s32.totalorder %s448_s15, 4   ;;  %s527_s9 = smov %s394_s10 }
  0x41   : > { %s528_s10 = smov %s398_s11  ;;  %s529_s11 = smov %s459_s18 }
  0x42   : > { %s530_s12 = smov %s448_s15  ;;  %14 = sbr.rel (!%p12_p9) target bundleno = 3 (0x3), region = 66 }
  0x47   :  { %221 = vsyncpa [#allocation3], 1 }
  0x48   :  { %223 = vsyncpa [#allocation3 + $0x1], 1 }

</bundles_post_ra>
